<compile_context>
chip_gen: v5e
topology: v5e:2x2
jax: 0.10.0
libtpu: 0.0.40
codegen_flags: <defaults>
</compile_context>

<pallas_src>
import jax
import jax.numpy as jnp
from jax.experimental import pallas as pl
from jax.experimental.pallas import tpu as pltpu


def _bitonic_sort_segments_axis0(x, seg):
    """Ascending sort of each contiguous `seg`-row segment along axis 0.

    Partner exchange i <-> i^j is realized with static sublane rolls
    (i^j == i+j when bit j of i is 0, i-j otherwise) plus a select, so every
    stage is XLU/VPU work — no matmuls, no gathers.  Requires `seg` to be a
    power of two and to divide x.shape[0]; segments are aligned to multiples
    of `seg`, so bit-j flips never cross a segment boundary (j < seg).
    """
    n, p = x.shape
    assert seg & (seg - 1) == 0, "segment size must be a power of two"
    assert n % seg == 0, "segment size must divide the number of rows"

    # Per-row index *within its segment* (drives ascending/is_lower masks).
    row = jax.lax.broadcasted_iota(jnp.int32, (n, p), 0) & (seg - 1)

    k = 2
    while k <= seg:
        j = k // 2
        while j >= 1:
            # Value of row i+j (mod n) and row i-j (mod n) via sublane rolls.
            fwd = pltpu.roll(x, n - j, axis=0)   # x[(i + j) mod n]
            bwd = pltpu.roll(x, j, axis=0)       # x[(i - j) mod n]
            is_lower = (row & j) == 0            # partner index is i + j
            partner = jnp.where(is_lower, fwd, bwd)
            ascending = (row & k) == 0
            take_min = is_lower == ascending
            x = jnp.where(take_min,
                          jnp.minimum(x, partner),
                          jnp.maximum(x, partner))
            j //= 2
        k *= 2
    return x


def _swd_kernel(xy_ref, theta_ref, out_ref):
    """One projection tile: project, sort both halves, accumulate sum((Δ)^2)."""
    b2 = xy_ref.shape[0]
    b = b2 // 2

    @pl.when(pl.program_id(0) == 0)
    def _init():
        out_ref[...] = jnp.zeros_like(out_ref)

    # Single fused projection matmul: [2B, F] @ [F, tile_P] -> f32 [2B, tile_P].
    proj = jnp.dot(xy_ref[...], theta_ref[...],
                   preferred_element_type=jnp.float32)

    # Sort the true (rows [0, B)) and generated (rows [B, 2B)) projections
    # independently along the batch axis in one segmented pass.
    proj_sorted = _bitonic_sort_segments_axis0(proj, seg=b)

    diff = proj_sorted[:b, :] - proj_sorted[b:, :]
    sq = diff * diff
    per_row = jnp.sum(sq, axis=1, keepdims=True)      # [B, 1]
    total = jnp.sum(per_row, axis=0, keepdims=True)   # [1, 1]
    out_ref[...] += total


def swd_loss_pallas(true_distribution, generated_distribution, theta,
                    *, tile_p=128, matmul_dtype=jnp.float32):
    """SWD between two [batch, feature] sample sets given theta [feature, P].

    `matmul_dtype=jnp.bfloat16` feeds the projection matmul in bf16 (native
    MXU rate / half the DMA bytes on v6e/v7x); the sort/compare path and the
    accumulation stay in f32 either way.
    """
    assert true_distribution.shape == generated_distribution.shape
    b, f = true_distribution.shape
    assert b & (b - 1) == 0, "batch size must be a power of two for the sort"
    f_theta, p = theta.shape
    assert f_theta == f
    assert tile_p % 128 == 0, "projection tile must be lane-dense (x128)"

    num_blocks = pl.cdiv(p, tile_p)
    p_pad = num_blocks * tile_p

    # Fuse the two sample sets along the batch axis -> one matmul per tile.
    xy = jnp.concatenate([true_distribution, generated_distribution],
                         axis=0).astype(matmul_dtype)          # [2B, F]
    theta_t = theta.astype(matmul_dtype)
    if p_pad != p:
        # Zero-padded projection directions contribute exactly 0 to the loss.
        theta_t = jnp.pad(theta_t, ((0, 0), (0, p_pad - p)))   # [F, P_pad]

    total = pl.pallas_call(
        _swd_kernel,
        out_shape=jax.ShapeDtypeStruct((1, 1), jnp.float32),
        grid=(num_blocks,),
        in_specs=[
            pl.BlockSpec((2 * b, f), lambda pi: (0, 0)),
            pl.BlockSpec((f, tile_p), lambda pi: (0, pi)),
        ],
        # Resident accumulator block, revisited across the projection grid.
        out_specs=pl.BlockSpec((1, 1), lambda pi: (0, 0)),
        compiler_params=pltpu.CompilerParams(
            dimension_semantics=("arbitrary",),
        ),
    )(xy, theta_t)

    # Normalize by the ORIGINAL b * num_projections (padded columns are zero).
    return total[0, 0] / jnp.float32(b * p)


def sample_hypersphere(feature_dim, n, key):
    """Rows uniform on S^{d-1} (stand-in for the torch sample_hypersphere)."""
    v = jax.random.normal(key, (n, feature_dim), dtype=jnp.float32)
    v = v / jnp.linalg.norm(v, axis=1, keepdims=True)
    return v  # [n, feature_dim]


def swd_loss_reference(true_distribution, generated_distribution, theta):
    proj_t = jnp.sort(true_distribution @ theta, axis=0)
    proj_f = jnp.sort(generated_distribution @ theta, axis=0)
    return jnp.mean((proj_t - proj_f) ** 2)


if __name__ == "__main__":
    num_projections = 100
    batch, feature_dim = 8, 32

    key = jax.random.PRNGKey(0)
    k_true, k_fake, k_theta = jax.random.split(key, 3)

    true_dist = jax.random.normal(k_true, (batch, feature_dim), dtype=jnp.float32)
    fake_dist = (jax.random.normal(k_fake, (batch, feature_dim), dtype=jnp.float32)
                 * 1.5 + 0.3)

    # theta = sample_hypersphere(D, n=P).T  ->  [feature_dim, num_projections]
    theta = sample_hypersphere(feature_dim, num_projections, k_theta).T

    loss = jax.jit(swd_loss_pallas)(true_dist, fake_dist, theta)
    jax.block_until_ready(loss)

    ref = swd_loss_reference(true_dist, fake_dist, theta)
    assert jnp.allclose(loss, ref, rtol=1e-5, atol=1e-5), (loss, ref)

    print("KERNEL_OK")
</pallas_src>

<mosaic_0001>
module attributes {stable_mosaic.version = 11 : i64} {
  func.func @_swd_kernel(%arg0: i32, %arg1: memref<16x32xf32, #tpu.memory_space<vmem>>, %arg2: memref<32x128xf32, #tpu.memory_space<vmem>>, %arg3: memref<1x1xf32, #tpu.memory_space<vmem>>) attributes {dimension_semantics = [#tpu.dimension_semantics<arbitrary>], iteration_bounds = array<i64: 1>, scalar_prefetch = 0 : i64, scratch_operands = 0 : i64, tpu.core_type = #tpu.core_type<tc>, window_params = [{pipeline_mode = #tpu.pipeline_mode<synchronous>, transform_indices = @transform_0, window_bounds = array<i64: 16, 32>}, {transform_indices = @transform_1, window_bounds = array<i64: 32, 128>}, {pipeline_mode = #tpu.pipeline_mode<synchronous>, transform_indices = @transform_2, window_bounds = array<i64: 1, 1>}]} {
    %c0_i32 = arith.constant 0 : i32
    %0 = arith.cmpi eq, %arg0, %c0_i32 : i32
    %1 = arith.extui %0 : i1 to i32
    %c0_i32_0 = arith.constant 0 : i32
    %2 = arith.cmpi ne, %1, %c0_i32_0 : i32
    scf.if %2 {
      %cst_45 = arith.constant 0.000000e+00 : f32
      %116 = vector.broadcast %cst_45 : f32 to vector<1x1xf32>
      %c0_46 = arith.constant 0 : index
      %c0_47 = arith.constant 0 : index
      %117 = vector.load %arg3[%c0_46, %c0_47] : memref<1x1xf32, #tpu.memory_space<vmem>>, vector<1x1xf32>
      tpu.vector_store %arg3[%c0_46, %c0_47], %116 {strides = array<i32>} : memref<1x1xf32, #tpu.memory_space<vmem>>, vector<1x1xf32>,
    } else {
    }
    %c0 = arith.constant 0 : index
    %c0_1 = arith.constant 0 : index
    %3 = vector.load %arg1[%c0, %c0_1] : memref<16x32xf32, #tpu.memory_space<vmem>>, vector<16x32xf32>
    %c0_2 = arith.constant 0 : index
    %c0_3 = arith.constant 0 : index
    %4 = vector.load %arg2[%c0_2, %c0_3] : memref<32x128xf32, #tpu.memory_space<vmem>>, vector<32x128xf32>
    %cst = arith.constant dense<0.000000e+00> : vector<16x128xf32>
    %5 = tpu.matmul %3, %4, %cst {dimension_numbers = #tpu.dot_dimension_numbers<[1], [0], [0], [1], [0, 0, 1, 1], [], []>} : vector<16x32xf32>, vector<32x128xf32>, vector<16x128xf32> -> vector<16x128xf32>
    %6 = tpu.iota {dimensions = array<i32: 0>} : vector<16x128xi32>
    %c7_i32 = arith.constant 7 : i32
    %7 = vector.broadcast %c7_i32 : i32 to vector<16x128xi32>
    %8 = arith.andi %6, %7 : vector<16x128xi32>
    %c15_i32 = arith.constant 15 : i32
    %9 = tpu.dynamic_rotate %5 by %c15_i32 dim 0 : vector<16x128xf32>, i32 -> vector<16x128xf32>
    %c1_i32 = arith.constant 1 : i32
    %10 = tpu.dynamic_rotate %5 by %c1_i32 dim 0 : vector<16x128xf32>, i32 -> vector<16x128xf32>
    %c1_i32_4 = arith.constant 1 : i32
    %11 = vector.broadcast %c1_i32_4 : i32 to vector<16x128xi32>
    %12 = arith.andi %8, %11 : vector<16x128xi32>
    %c0_i32_5 = arith.constant 0 : i32
    %13 = vector.broadcast %c0_i32_5 : i32 to vector<16x128xi32>
    %14 = arith.cmpi eq, %12, %13 : vector<16x128xi32>
    %15 = arith.select %14, %9, %10 : vector<16x128xi1>, vector<16x128xf32>
    %c2_i32 = arith.constant 2 : i32
    %16 = vector.broadcast %c2_i32 : i32 to vector<16x128xi32>
    %17 = arith.andi %8, %16 : vector<16x128xi32>
    %c0_i32_6 = arith.constant 0 : i32
    %18 = vector.broadcast %c0_i32_6 : i32 to vector<16x128xi32>
    %19 = arith.cmpi eq, %17, %18 : vector<16x128xi32>
    %20 = arith.xori %14, %19 : vector<16x128xi1>
    %cst_7 = arith.constant dense<true> : vector<16x128xi1>
    %21 = arith.xori %20, %cst_7 : vector<16x128xi1>
    %22 = arith.minimumf %5, %15 : vector<16x128xf32>
    %23 = arith.maximumf %5, %15 : vector<16x128xf32>
    %24 = arith.select %21, %22, %23 : vector<16x128xi1>, vector<16x128xf32>
    %c14_i32 = arith.constant 14 : i32
    %25 = tpu.dynamic_rotate %24 by %c14_i32 dim 0 : vector<16x128xf32>, i32 -> vector<16x128xf32>
    %c2_i32_8 = arith.constant 2 : i32
    %26 = tpu.dynamic_rotate %24 by %c2_i32_8 dim 0 : vector<16x128xf32>, i32 -> vector<16x128xf32>
    %c2_i32_9 = arith.constant 2 : i32
    %27 = vector.broadcast %c2_i32_9 : i32 to vector<16x128xi32>
    %28 = arith.andi %8, %27 : vector<16x128xi32>
    %c0_i32_10 = arith.constant 0 : i32
    %29 = vector.broadcast %c0_i32_10 : i32 to vector<16x128xi32>
    %30 = arith.cmpi eq, %28, %29 : vector<16x128xi32>
    %31 = arith.select %30, %25, %26 : vector<16x128xi1>, vector<16x128xf32>
    %c4_i32 = arith.constant 4 : i32
    %32 = vector.broadcast %c4_i32 : i32 to vector<16x128xi32>
    %33 = arith.andi %8, %32 : vector<16x128xi32>
    %c0_i32_11 = arith.constant 0 : i32
    %34 = vector.broadcast %c0_i32_11 : i32 to vector<16x128xi32>
    %35 = arith.cmpi eq, %33, %34 : vector<16x128xi32>
    %36 = arith.xori %30, %35 : vector<16x128xi1>
    %cst_12 = arith.constant dense<true> : vector<16x128xi1>
    %37 = arith.xori %36, %cst_12 : vector<16x128xi1>
    %38 = arith.minimumf %24, %31 : vector<16x128xf32>
    %39 = arith.maximumf %24, %31 : vector<16x128xf32>
    %40 = arith.select %37, %38, %39 : vector<16x128xi1>, vector<16x128xf32>
    %c15_i32_13 = arith.constant 15 : i32
    %41 = tpu.dynamic_rotate %40 by %c15_i32_13 dim 0 : vector<16x128xf32>, i32 -> vector<16x128xf32>
    %c1_i32_14 = arith.constant 1 : i32
    %42 = tpu.dynamic_rotate %40 by %c1_i32_14 dim 0 : vector<16x128xf32>, i32 -> vector<16x128xf32>
    %c1_i32_15 = arith.constant 1 : i32
    %43 = vector.broadcast %c1_i32_15 : i32 to vector<16x128xi32>
    %44 = arith.andi %8, %43 : vector<16x128xi32>
    %c0_i32_16 = arith.constant 0 : i32
    %45 = vector.broadcast %c0_i32_16 : i32 to vector<16x128xi32>
    %46 = arith.cmpi eq, %44, %45 : vector<16x128xi32>
    %47 = arith.select %46, %41, %42 : vector<16x128xi1>, vector<16x128xf32>
    %c4_i32_17 = arith.constant 4 : i32
    %48 = vector.broadcast %c4_i32_17 : i32 to vector<16x128xi32>
    %49 = arith.andi %8, %48 : vector<16x128xi32>
    %c0_i32_18 = arith.constant 0 : i32
    %50 = vector.broadcast %c0_i32_18 : i32 to vector<16x128xi32>
    %51 = arith.cmpi eq, %49, %50 : vector<16x128xi32>
    %52 = arith.xori %46, %51 : vector<16x128xi1>
    %cst_19 = arith.constant dense<true> : vector<16x128xi1>
    %53 = arith.xori %52, %cst_19 : vector<16x128xi1>
    %54 = arith.minimumf %40, %47 : vector<16x128xf32>
    %55 = arith.maximumf %40, %47 : vector<16x128xf32>
    %56 = arith.select %53, %54, %55 : vector<16x128xi1>, vector<16x128xf32>
    %c12_i32 = arith.constant 12 : i32
    %57 = tpu.dynamic_rotate %56 by %c12_i32 dim 0 : vector<16x128xf32>, i32 -> vector<16x128xf32>
    %c4_i32_20 = arith.constant 4 : i32
    %58 = tpu.dynamic_rotate %56 by %c4_i32_20 dim 0 : vector<16x128xf32>, i32 -> vector<16x128xf32>
    %c4_i32_21 = arith.constant 4 : i32
    %59 = vector.broadcast %c4_i32_21 : i32 to vector<16x128xi32>
    %60 = arith.andi %8, %59 : vector<16x128xi32>
    %c0_i32_22 = arith.constant 0 : i32
    %61 = vector.broadcast %c0_i32_22 : i32 to vector<16x128xi32>
    %62 = arith.cmpi eq, %60, %61 : vector<16x128xi32>
    %63 = arith.select %62, %57, %58 : vector<16x128xi1>, vector<16x128xf32>
    %c8_i32 = arith.constant 8 : i32
    %64 = vector.broadcast %c8_i32 : i32 to vector<16x128xi32>
    %65 = arith.andi %8, %64 : vector<16x128xi32>
    %c0_i32_23 = arith.constant 0 : i32
    %66 = vector.broadcast %c0_i32_23 : i32 to vector<16x128xi32>
    %67 = arith.cmpi eq, %65, %66 : vector<16x128xi32>
    %68 = arith.xori %62, %67 : vector<16x128xi1>
    %cst_24 = arith.constant dense<true> : vector<16x128xi1>
    %69 = arith.xori %68, %cst_24 : vector<16x128xi1>
    %70 = arith.minimumf %56, %63 : vector<16x128xf32>
    %71 = arith.maximumf %56, %63 : vector<16x128xf32>
    %72 = arith.select %69, %70, %71 : vector<16x128xi1>, vector<16x128xf32>
    %c14_i32_25 = arith.constant 14 : i32
    %73 = tpu.dynamic_rotate %72 by %c14_i32_25 dim 0 : vector<16x128xf32>, i32 -> vector<16x128xf32>
    %c2_i32_26 = arith.constant 2 : i32
    %74 = tpu.dynamic_rotate %72 by %c2_i32_26 dim 0 : vector<16x128xf32>, i32 -> vector<16x128xf32>
    %c2_i32_27 = arith.constant 2 : i32
    %75 = vector.broadcast %c2_i32_27 : i32 to vector<16x128xi32>
    %76 = arith.andi %8, %75 : vector<16x128xi32>
    %c0_i32_28 = arith.constant 0 : i32
    %77 = vector.broadcast %c0_i32_28 : i32 to vector<16x128xi32>
    %78 = arith.cmpi eq, %76, %77 : vector<16x128xi32>
    %79 = arith.select %78, %73, %74 : vector<16x128xi1>, vector<16x128xf32>
    %c8_i32_29 = arith.constant 8 : i32
    %80 = vector.broadcast %c8_i32_29 : i32 to vector<16x128xi32>
    %81 = arith.andi %8, %80 : vector<16x128xi32>
    %c0_i32_30 = arith.constant 0 : i32
    %82 = vector.broadcast %c0_i32_30 : i32 to vector<16x128xi32>
    %83 = arith.cmpi eq, %81, %82 : vector<16x128xi32>
    %84 = arith.xori %78, %83 : vector<16x128xi1>
    %cst_31 = arith.constant dense<true> : vector<16x128xi1>
    %85 = arith.xori %84, %cst_31 : vector<16x128xi1>
    %86 = arith.minimumf %72, %79 : vector<16x128xf32>
    %87 = arith.maximumf %72, %79 : vector<16x128xf32>
    %88 = arith.select %85, %86, %87 : vector<16x128xi1>, vector<16x128xf32>
    %c15_i32_32 = arith.constant 15 : i32
    %89 = tpu.dynamic_rotate %88 by %c15_i32_32 dim 0 : vector<16x128xf32>, i32 -> vector<16x128xf32>
    %c1_i32_33 = arith.constant 1 : i32
    %90 = tpu.dynamic_rotate %88 by %c1_i32_33 dim 0 : vector<16x128xf32>, i32 -> vector<16x128xf32>
    %c1_i32_34 = arith.constant 1 : i32
    %91 = vector.broadcast %c1_i32_34 : i32 to vector<16x128xi32>
    %92 = arith.andi %8, %91 : vector<16x128xi32>
    %c0_i32_35 = arith.constant 0 : i32
    %93 = vector.broadcast %c0_i32_35 : i32 to vector<16x128xi32>
    %94 = arith.cmpi eq, %92, %93 : vector<16x128xi32>
    %95 = arith.select %94, %89, %90 : vector<16x128xi1>, vector<16x128xf32>
    %c8_i32_36 = arith.constant 8 : i32
    %96 = vector.broadcast %c8_i32_36 : i32 to vector<16x128xi32>
    %97 = arith.andi %8, %96 : vector<16x128xi32>
    %c0_i32_37 = arith.constant 0 : i32
    %98 = vector.broadcast %c0_i32_37 : i32 to vector<16x128xi32>
    %99 = arith.cmpi eq, %97, %98 : vector<16x128xi32>
    %100 = arith.xori %94, %99 : vector<16x128xi1>
    %cst_38 = arith.constant dense<true> : vector<16x128xi1>
    %101 = arith.xori %100, %cst_38 : vector<16x128xi1>
    %102 = arith.minimumf %88, %95 : vector<16x128xf32>
    %103 = arith.maximumf %88, %95 : vector<16x128xf32>
    %104 = arith.select %101, %102, %103 : vector<16x128xi1>, vector<16x128xf32>
    %105 = vector.extract_strided_slice %104 {offsets = [0, 0], sizes = [8, 128], strides = [1, 1]} : vector<16x128xf32> to vector<8x128xf32>
    %106 = vector.extract_strided_slice %104 {offsets = [8, 0], sizes = [8, 128], strides = [1, 1]} : vector<16x128xf32> to vector<8x128xf32>
    %107 = arith.subf %105, %106 : vector<8x128xf32>
    %108 = arith.mulf %107, %107 : vector<8x128xf32>
    %cst_39 = arith.constant dense<0.000000e+00> : vector<8xf32>
    %109 = vector.multi_reduction <add>, %108, %cst_39 [1] : vector<8x128xf32> to vector<8xf32>
    %110 = vector.shape_cast %109 : vector<8xf32> to vector<8x1xf32>
    %cst_40 = arith.constant dense<0.000000e+00> : vector<1xf32>
    %111 = vector.multi_reduction <add>, %110, %cst_40 [0] : vector<8x1xf32> to vector<1xf32>
    %112 = vector.shape_cast %111 : vector<1xf32> to vector<1x1xf32>
    %c0_41 = arith.constant 0 : index
    %c0_42 = arith.constant 0 : index
    %113 = vector.load %arg3[%c0_41, %c0_42] : memref<1x1xf32, #tpu.memory_space<vmem>>, vector<1x1xf32>
    %114 = arith.addf %113, %112 : vector<1x1xf32>
    %c0_43 = arith.constant 0 : index
    %c0_44 = arith.constant 0 : index
    %115 = vector.load %arg3[%c0_43, %c0_44] : memref<1x1xf32, #tpu.memory_space<vmem>>, vector<1x1xf32>
    tpu.vector_store %arg3[%c0_43, %c0_44], %114 {strides = array<i32>} : memref<1x1xf32, #tpu.memory_space<vmem>>, vector<1x1xf32>,
    return
  }
  func.func @transform_0(%arg0: i32) -> (i32, i32) {
    %c0_i32 = arith.constant 0 : i32
    %c0_i32_0 = arith.constant 0 : i32
    %c0_i32_1 = arith.constant 0 : i32
    return %c0_i32, %c0_i32_0 : i32, i32
  }
  func.func @transform_1(%arg0: i32) -> (i32, i32) {
    %c0_i32 = arith.constant 0 : i32
    %c0_i32_0 = arith.constant 0 : i32
    return %c0_i32, %arg0 : i32, i32
  }
  func.func @transform_2(%arg0: i32) -> (i32, i32) {
    %c0_i32 = arith.constant 0 : i32
    %c0_i32_0 = arith.constant 0 : i32
    %c0_i32_1 = arith.constant 0 : i32
    return %c0_i32, %c0_i32_0 : i32, i32
  }
}

</mosaic_0001>

<bundles_post_ra>
// kernel: swd_loss_pallas.1
= control target key start
LH: loop header
LB: loop body
LE: loop exit
PB: predicated region body
PF: predicated region fallthrough
CT: control target
= control target key end

     0   :  { %s453_s0 = inlined_call_operand.vmem [shape: f32[16,32], index: 0, kind: input, shape index: {}]   ;;  %s454_s1 = inlined_call_operand.vmem [shape: f32[32,128], index: 1, kind: input, shape index: {}]   ;;  %s455_s2 = inlined_call_operand.hbm [shape: f32[1,1], index: 2, kind: output, shape index: {}]  }
   0x1   :  { %v23_v0 = vld [vmem:[%s454_s1 + $0x18] sm:$0xff]  ;;  %v22_v1 = vld [vmem:[%s454_s1 + $0x10] sm:$0xff]  ;;  %v21_v2 = vld [vmem:[%s454_s1 + $0x8] sm:$0xff] }
   0x2   :  { %43 = vmatpush.msra.mxu0 %v23_v0  ;;  %228 = vmatpush.msra.mxu1 %v23_v0 }
   0x3   :  { %7 = vsyncpa [#allocation3], 0  ;;  %v20_v3 = vld [vmem:[%s454_s1] sm:$0xff]  ;;  %vm24_vm0 = vcmask 261120   ;;  %v19_v5 = vld [vmem:[%s453_s0 + $0x8] sm:$0xff]  ;;  %v54_v6 = vlaneseq  ;;  %vm261_vm9 = vmmov 1  }
   0x4   :  { %44 = vmatpush.msra.mxu0 %v22_v1  ;;  %229 = vmatpush.msra.mxu1 %v22_v1  ;;  %v18_v4 = vld [vmem:[%s453_s0] sm:$0xff]  ;;  %v262_v1 = vmov 0.0   ;;  %s263_s0 = smov [#allocation2]   ;;  %s217_s23 = sshll.u32 %s455_s2, 4  ;;  %s218_s23 = int_to_ptr.hbm [resolvable:$true] %s217_s23 }
   0x5   :  { %v297_v7 = vshrl.u32 %v54_v6, 7  ;;  %s215_s1 = sshll.u32 %s263_s0, 4  ;;  %s216_s1 = int_to_ptr.vmem [resolvable:$true] %s215_s1 }
   0x6   :  { %45 = vmatpush.msra.mxu0 %v21_v2  ;;  %230 = vmatpush.msra.mxu1 %v21_v2 }
   0x7   :  { %v56_v8 = vadd.s32 8, %v297_v7  ;;  %v57_v9 = vand.u32 7, %v297_v7  ;;  %vm61_vm5 = vcmp.lt.s32.totalorder %v297_v7, 7  ;;  %vm456_vm6 = vcmp.lt.s32.totalorder %v297_v7, 1 }
   0x8   :  { %46 = vmatpush.msra.mxu0 %v20_v3  ;;  %231 = vmatpush.msra.mxu1 %v20_v3  ;;  %vm91_vm14 = vcmp.lt.s32.totalorder %v297_v7, 6  ;;  %vm96_vm15 = vcmp.lt.s32.totalorder %v297_v7, 2 }
   0x9   :  { %226 = vmatmul.msk.f32.vlgmr.msra.gmra.mxu0 %vm24_vm0, %v18_v4  ;;  %227 = vmatmul.msk.f32.vlgmr.msra.gmra.mxu1 %vm24_vm0, %v19_v5  ;;  %v58_v10 = vand.u32 7, %v56_v8  ;;  %v69_v11 = vand.u32 1, %v57_v9  ;;  %v75_v12 = vand.u32 2, %v57_v9  ;;  %v101_v21 = vand.u32 4, %v57_v9 }
   0xb   :  { %v70_v13 = vand.u32 1, %v58_v10  ;;  %v76_v14 = vand.u32 2, %v58_v10  ;;  %vm301_vm1 = vcmp.eq.s32.totalorder %v69_v11, 0  ;;  %vm305_vm2 = vcmp.eq.s32.totalorder %v75_v12, 0 }
   0xc   :  { %vm79_vm7 = vmxor %vm301_vm1, %vm305_vm2  ;;  %v102_v22 = vand.u32 4, %v58_v10  ;;  %vm341_vm12 = vcmp.eq.s32.totalorder %v101_v21, 0 }
   0xd   :  { %vm309_vm3 = vcmp.eq.s32.totalorder %v70_v13, 0  ;;  %vm313_vm4 = vcmp.eq.s32.totalorder %v76_v14, 0  ;;  %vm81_vm10 = vmxor %vm79_vm7, %vm261_vm9 }
   0xe   :  { %vm80_vm8 = vmxor %vm309_vm3, %vm313_vm4  ;;  %vm345_vm13 = vcmp.eq.s32.totalorder %v102_v22, 0 }
   0xf   :  { %vm82_vm11 = vmxor %vm80_vm8, %vm261_vm9 }
  0x10   :  { %vm105_vm0 = vmxor %vm305_vm2, %vm341_vm12 }
  0x11   :  { %vm106_vm7 = vmxor %vm313_vm4, %vm345_vm13 }
  0x12   :  { %vm107_vm8 = vmxor %vm105_vm0, %vm261_vm9 }
  0x13   :  { %vm125_vm0 = vmxor %vm301_vm1, %vm341_vm12 }
  0x86   :  { %v48_v19 = vpop.f32.mrf.mxu0  ;;  %v51_v20 = vpop.f32.mrf.mxu1 }
  0x87   :  { %v59_v23 = vrot.slane %v48_v19, 1  ;;  %v64_v24 = vrot.slane %v48_v19, 7  ;;  %v60_v25 = vrot.slane %v51_v20, 1  ;;  %v65_v26 = vrot.slane %v51_v20, 7 }
  0x89   :  { %v62_v27 = vsel %vm61_vm5, %v59_v23, %v60_v25  ;;  %v63_v28 = vsel %vm61_vm5, %v60_v25, %v59_v23  ;;  %v67_v29 = vsel %vm456_vm6, %v64_v24, %v65_v26  ;;  %v68_v30 = vsel %vm456_vm6, %v65_v26, %v64_v24 }
  0x8a   :  { %v73_v31 = vsel %vm301_vm1, %v62_v27, %v68_v30  ;;  %v74_v32 = vsel %vm309_vm3, %v63_v28, %v67_v29 }
  0x8b   :  { %v83_v35 = vmin.f32 %v48_v19, %v73_v31  ;;  %v84_v36 = vmin.f32 %v51_v20, %v74_v32  ;;  %v85_v37 = vmax.f32 %v48_v19, %v73_v31  ;;  %v86_v38 = vmax.f32 %v51_v20, %v74_v32 }
  0x8d   :  { %v87_v39 = vsel %vm81_vm10, %v83_v35, %v85_v37  ;;  %v88_v40 = vsel %vm82_vm11, %v84_v36, %v86_v38  ;;  %vm108_vm10 = vmxor %vm106_vm7, %vm261_vm9  ;;  %vm457_vm7 = vcmask 0  }
  0x8e   :  { %v89_v41 = vrot.slane %v87_v39, 2  ;;  %v90_v42 = vrot.slane %v88_v40, 2  ;;  %v94_v43 = vrot.slane %v87_v39, 6  ;;  %v95_v44 = vrot.slane %v88_v40, 6  ;;  %vm126_vm11 = vmxor %vm309_vm3, %vm345_vm13  ;;  %17 = vst.msk [vmem:[#allocation2] sm:$0x1] %vm457_vm7, %v262_v1 }
  0x8f   :  { %vm147_vm7 = vmxor %vm345_vm13, %vm261_vm9 }
  0x90   :  { %v92_v45 = vsel %vm91_vm14, %v89_v41, %v90_v42  ;;  %v93_v46 = vsel %vm91_vm14, %v90_v42, %v89_v41  ;;  %v97_v47 = vsel %vm96_vm15, %v94_v43, %v95_v44  ;;  %v98_v48 = vsel %vm96_vm15, %v95_v44, %v94_v43 }
  0x91   :  { %v99_v49 = vsel %vm305_vm2, %v92_v45, %v98_v48  ;;  %v100_v50 = vsel %vm313_vm4, %v93_v46, %v97_v47 }
  0x92   :  { %v109_v51 = vmin.f32 %v87_v39, %v99_v49  ;;  %v110_v52 = vmin.f32 %v88_v40, %v100_v50  ;;  %v111_v53 = vmax.f32 %v87_v39, %v99_v49  ;;  %v112_v54 = vmax.f32 %v88_v40, %v100_v50 }
  0x94   :  { %v113_v55 = vsel %vm107_vm8, %v109_v51, %v111_v53  ;;  %v114_v56 = vsel %vm108_vm10, %v110_v52, %v112_v54  ;;  %vm128_vm8 = vmxor %vm126_vm11, %vm261_vm9 }
  0x95   :  { %v115_v57 = vrot.slane %v113_v55, 1  ;;  %v116_v58 = vrot.slane %v114_v56, 1  ;;  %v119_v59 = vrot.slane %v113_v55, 7  ;;  %v120_v60 = vrot.slane %v114_v56, 7  ;;  %vm127_vm10 = vmxor %vm125_vm0, %vm261_vm9 }
  0x96   :  { %vm146_vm11 = vmxor %vm341_vm12, %vm261_vm9 }
  0x97   :  { %v117_v61 = vsel %vm61_vm5, %v115_v57, %v116_v58  ;;  %v118_v62 = vsel %vm61_vm5, %v116_v58, %v115_v57  ;;  %v121_v63 = vsel %vm456_vm6, %v119_v59, %v120_v60  ;;  %v122_v0 = vsel %vm456_vm6, %v120_v60, %v119_v59  ;;  %vm148_vm0 = vmxor %vm146_vm11, %vm261_vm9 }
  0x98   :  { %v123_v2 = vsel %vm301_vm1, %v117_v61, %v122_v0  ;;  %v124_v3 = vsel %vm309_vm3, %v118_v62, %v121_v63  ;;  %vm137_vm6 = vcmp.lt.s32.totalorder %v297_v7, 4  ;;  %v206_v63 = vld [vmem:[#allocation2] sm:$0x1] }
  0x99   :  { %v129_v4 = vmin.f32 %v113_v55, %v123_v2  ;;  %v130_v5 = vmin.f32 %v114_v56, %v124_v3  ;;  %v131_v6 = vmax.f32 %v113_v55, %v123_v2  ;;  %v132_v8 = vmax.f32 %v114_v56, %v124_v3 }
  0x9b   :  { %v134_v9 = vsel %vm128_vm8, %v130_v5, %v132_v8  ;;  %v133_v10 = vsel %vm127_vm10, %v129_v4, %v131_v6  ;;  %vm149_vm8 = vmxor %vm147_vm7, %vm261_vm9 }
  0x9c   :  { %v136_v11 = vrot.slane %v134_v9, 4  ;;  %v135_v12 = vrot.slane %v133_v10, 4 }
  0x9e   :  { %v138_v13 = vsel %vm137_vm6, %v135_v12, %v136_v11  ;;  %v139_v14 = vsel %vm137_vm6, %v136_v11, %v135_v12  ;;  %vm166_vm6 = vmxor %vm305_vm2, %vm261_vm9 }
  0x9f   :  { %v140_v19 = vsel %vm341_vm12, %v138_v13, %v139_v14  ;;  %v141_v20 = vsel %vm345_vm13, %v139_v14, %v138_v13  ;;  %vm167_vm12 = vmxor %vm313_vm4, %vm261_vm9 }
  0xa0   :  { %v150_v21 = vmin.f32 %v133_v10, %v140_v19  ;;  %v151_v22 = vmin.f32 %v134_v9, %v141_v20  ;;  %v152_v23 = vmax.f32 %v133_v10, %v140_v19  ;;  %v153_v24 = vmax.f32 %v134_v9, %v141_v20  ;;  %vm168_vm13 = vmxor %vm166_vm6, %vm261_vm9 }
  0xa1   :  { %vm169_vm7 = vmxor %vm167_vm12, %vm261_vm9 }
  0xa2   :  { %v154_v25 = vsel %vm148_vm0, %v150_v21, %v152_v23  ;;  %v155_v26 = vsel %vm149_vm8, %v151_v22, %v153_v24 }
  0xa3   :  { %v156_v27 = vrot.slane %v154_v25, 2  ;;  %v157_v28 = vrot.slane %v155_v26, 2  ;;  %v160_v29 = vrot.slane %v154_v25, 6  ;;  %v161_v30 = vrot.slane %v155_v26, 6 }
  0xa5   :  { %v158_v31 = vsel %vm91_vm14, %v156_v27, %v157_v28  ;;  %v159_v32 = vsel %vm91_vm14, %v157_v28, %v156_v27  ;;  %v162_v33 = vsel %vm96_vm15, %v160_v29, %v161_v30  ;;  %v163_v34 = vsel %vm96_vm15, %v161_v30, %v160_v29  ;;  %vm186_vm14 = vmxor %vm301_vm1, %vm261_vm9 }
  0xa6   :  { %v164_v35 = vsel %vm305_vm2, %v158_v31, %v163_v34  ;;  %v165_v36 = vsel %vm313_vm4, %v159_v32, %v162_v33  ;;  %vm187_vm2 = vmxor %vm309_vm3, %vm261_vm9  ;;  %vm470_vm4 = vcmp.lt.s32.totalorder %v297_v7, 1 }
  0xa7   :  { %v170_v37 = vmin.f32 %v154_v25, %v164_v35  ;;  %v171_v38 = vmin.f32 %v155_v26, %v165_v36  ;;  %v172_v39 = vmax.f32 %v154_v25, %v164_v35  ;;  %v173_v40 = vmax.f32 %v155_v26, %v165_v36  ;;  %vm471_vm15 = vmmov %vm470_vm4 }
  0xa8   :  { %vm188_vm10 = vmxor %vm186_vm14, %vm261_vm9 }
  0xa9   :  { %v174_v41 = vsel %vm168_vm13, %v170_v37, %v172_v39  ;;  %v175_v42 = vsel %vm169_vm7, %v171_v38, %v173_v40  ;;  %vm189_vm11 = vmxor %vm187_vm2, %vm261_vm9 }
  0xaa   :  { %v176_v43 = vrot.slane %v174_v41, 1  ;;  %v177_v44 = vrot.slane %v175_v42, 1  ;;  %v180_v45 = vrot.slane %v174_v41, 7  ;;  %v181_v16 = vrot.slane %v175_v42, 7 }
  0xac   :  { %v178_v18 = vsel %vm61_vm5, %v176_v43, %v177_v44  ;;  %v179_v46 = vsel %vm61_vm5, %v177_v44, %v176_v43  ;;  %v182_v47 = vsel %vm470_vm4, %v180_v45, %v181_v16  ;;  %v183_v48 = vsel %vm471_vm15, %v181_v16, %v180_v45 }
  0xad   :  { %v184_v49 = vsel %vm301_vm1, %v178_v18, %v183_v48  ;;  %v185_v50 = vsel %vm309_vm3, %v179_v46, %v182_v47  ;;  %vm472_vm1 = vcmask 0  }
  0xae   :  { %v190_v51 = vmin.f32 %v174_v41, %v184_v49  ;;  %v191_v52 = vmin.f32 %v175_v42, %v185_v50  ;;  %v192_v53 = vmax.f32 %v174_v41, %v184_v49  ;;  %v193_v54 = vmax.f32 %v175_v42, %v185_v50 }
  0xb0   :  { %v194_v55 = vsel %vm188_vm10, %v190_v51, %v192_v53  ;;  %v195_v56 = vsel %vm189_vm11, %v191_v52, %v193_v54 }
  0xb1   :  { %v196_v57 = vsub.f32 %v194_v55, %v195_v56 }
  0xb3   :  { %v197_v58 = vmul.f32 %v196_v57, %v196_v57 }
  0xb5   :  { %198 = vadd.xlane.f32.xlu0 %v197_v58 }
 0x128   :  { %v199_v7 = vpop.xlane.xlu0 %198 }
 0x129   :  { %v200_v59 = vrot.slane %v199_v7, 4 }
 0x12b   :  { %v201_v60 = vadd.f32 %v200_v59, %v199_v7 }
 0x12d   :  { %v202_v61 = vrot.slane %v201_v60, 2 }
 0x12f   :  { %v203_v15 = vadd.f32 %v202_v61, %v201_v60 }
 0x131   :  { %v204_v62 = vrot.slane %v203_v15, 1 }
 0x133   :  { %v205_v17 = vadd.f32 %v204_v62, %v203_v15 }
 0x135   :  { %v207_v0 = vadd.f32 %v206_v63, %v205_v17 }
 0x137   :  { %209 = vst.msk [vmem:[#allocation2] sm:$0x1] %vm472_vm1, %v207_v0 }
 0x138   :  { %220 = dma.vmem_to_hbm [thread:$0]  %s216_s1, 16, %s218_s23, [#allocation3]  }
 0x139   :  { %259 = dma.done.wait [#allocation3], 16  }
 0x13a   :  { %260 = vsyncadd [#allocation3], 4294967280 }
 0x13b   :  { %225 = vsyncpa [#allocation3], 1 }

</bundles_post_ra>
